<compile_context>
chip_gen: v6e
topology: v6e:2x2x1
jax: 0.10.0
libtpu: 0.0.40
codegen_flags: <defaults>
</compile_context>

<pallas_src>
import math

import jax
import jax.numpy as jnp
from jax.experimental import pallas as pl
from jax.experimental.pallas import tpu as pltpu


# ----------------------------------------------------------------------------
# Kernels
# ----------------------------------------------------------------------------
def _affine_kernel_dout1(x_ref, w_ref, b_ref, o_ref):
    """Folded affine map for d_out == 1 (the deep_cfr value head case).

    x_ref: (d_in, tm)  activations, batch on the lane axis
    w_ref: (d_in, 1)   folded weight column (VMEM-resident across the grid)
    b_ref: (1, 1)      folded bias
    o_ref: (1, tm)     lane-dense output row
    """
    # VPU multiply (lane-broadcast of the weight column) + XLU sublane reduce.
    acc = jnp.sum(x_ref[...] * w_ref[...], axis=0, keepdims=True)
    o_ref[...] = (acc + b_ref[...]).astype(o_ref.dtype)


def _affine_kernel_general(x_ref, w_ref, b_ref, o_ref):
    """General folded affine map (d_out > 1): (d_out,d_in) @ (d_in,tm) on MXU."""
    o_ref[...] = (
        jnp.dot(w_ref[...], x_ref[...], preferred_element_type=jnp.float32)
        + b_ref[...]
    ).astype(o_ref.dtype)


# ----------------------------------------------------------------------------
# Parameter handling
# ----------------------------------------------------------------------------
def init_mlp_params(layer_sizes, key):
    """torch.nn.Linear default init: U(-1/sqrt(fan_in), 1/sqrt(fan_in)) for
    both weight and bias.  Weights are kept in torch layout: W (out, in),
    b (out,).  (MLP.reset() == calling this again with a new key.)
    """
    params = []
    for i in range(len(layer_sizes) - 1):
        fan_in, fan_out = layer_sizes[i], layer_sizes[i + 1]
        key, kw, kb = jax.random.split(key, 3)
        bound = 1.0 / math.sqrt(fan_in)
        w = jax.random.uniform(kw, (fan_out, fan_in), jnp.float32, -bound, bound)
        b = jax.random.uniform(kb, (fan_out,), jnp.float32, -bound, bound)
        params.append((w, b))
    return params


def fold_mlp_params(params):
    """Compose the activation-free Linear chain into one affine map.

    params: list of (W, b) in torch layout (W: (out, in), b: (out,)).
    Returns (W_total, b_total) with W_total (d_in0, d_out_last) and
    b_total (d_out_last,), such that  x @ W_total + b_total == MLP(x).
    Call once per parameter update, NOT per forward pass.
    """
    w0, b0 = params[0]
    w_tot = w0.T                     # (d_in0, out0)
    b_tot = b0                       # (out0,)
    for w, b in params[1:]:
        w_tot = w_tot @ w.T          # (d_in0, out_l)
        b_tot = b_tot @ w.T + b
    return w_tot, b_tot


def mlp_reference(x, params):
    """Plain-JAX layer-by-layer reference (nn.Linear semantics)."""
    h = x
    for w, b in params:
        h = h @ w.T + b
    return h


# ----------------------------------------------------------------------------
# Forward
# ----------------------------------------------------------------------------
def _batch_tiling(B):
    """Choose (padded_B, tm) for the batch(lane) axis."""
    if B < 256:
        # Single full-extent block; block_shape == array dims is always legal.
        return B, B
    # tm: multiple of 128 (unmasked lane-dense stores), aim for >= 2 grid
    # steps so both v7x TensorCores get work, cap at 4096 rows so the
    # double-buffered f32 x-tile stays <= 512 KiB on every generation.
    tm = min(4096, 128 * pl.cdiv(pl.cdiv(B, 2), 128))
    padded_B = tm * pl.cdiv(B, tm)
    return padded_B, tm


@jax.jit
def mlp_forward(x, w_folded, b_folded):
    """Fused MLP forward (single affine map) as one pallas_call.

    x:         (B, d_in)  float32
    w_folded:  (d_in, d_out)  from fold_mlp_params
    b_folded:  (d_out,)       from fold_mlp_params
    returns    (B, d_out)
    """
    B, d_in = x.shape
    d_out = w_folded.shape[1]

    padded_B, tm = _batch_tiling(B)
    grid = (padded_B // tm,)

    # Batch-on-lanes: present x as (d_in, B) so all elementwise work and the
    # output store are lane-dense.  Padding columns are zeros (sliced off
    # below), so they never affect real outputs.
    x_t = x.T
    if padded_B != B:
        x_t = jnp.pad(x_t, ((0, 0), (0, padded_B - B)))

    if d_out == 1:
        kernel = _affine_kernel_dout1
        w_arg = w_folded                 # (d_in, 1): weight column for VPU path
    else:
        kernel = _affine_kernel_general
        w_arg = w_folded.T               # (d_out, d_in) for W @ x on the MXU
    b_arg = b_folded.reshape(d_out, 1)

    out_t = pl.pallas_call(
        kernel,
        out_shape=jax.ShapeDtypeStruct((d_out, padded_B), x.dtype),
        grid=grid,
        in_specs=[
            pl.BlockSpec((d_in, tm), lambda i: (0, i)),      # x tiles, pipelined
            pl.BlockSpec(w_arg.shape, lambda i: (0, 0)),     # folded W, resident
            pl.BlockSpec((d_out, 1), lambda i: (0, 0)),      # folded b, resident
        ],
        out_specs=pl.BlockSpec((d_out, tm), lambda i: (0, i)),  # lane-dense out
        compiler_params=pltpu.CompilerParams(
            dimension_semantics=("parallel",)),  # megacore-shard batch tiles
    )(x_t, w_arg, b_arg)

    return out_t[:, :B].T


# ----------------------------------------------------------------------------
# Demo / self-check
# ----------------------------------------------------------------------------
if __name__ == "__main__":
    key = jax.random.PRNGKey(0)
    # MLP(layers=[16, 32, 32, 1])
    layer_sizes = (16, 32, 32, 1)

    key, kp = jax.random.split(key)
    params = init_mlp_params(layer_sizes, kp)
    w_fold, b_fold = fold_mlp_params(params)     # once per param update

    # Small batch: single full block, grid=(1,).
    key, kx = jax.random.split(key)
    x_small = jax.random.normal(kx, (8, layer_sizes[0]), jnp.float32)
    out_small = mlp_forward(x_small, w_fold, b_fold)
    jax.block_until_ready(out_small)
    ref_small = mlp_reference(x_small, params)
    assert out_small.shape == (8, 1)
    assert jnp.allclose(out_small, ref_small, atol=1e-5, rtol=1e-5)

    # Ragged batch: exercises the tiled + padded + 2-grid-step parallel path.
    key, kx2 = jax.random.split(key)
    x_big = jax.random.normal(kx2, (300, layer_sizes[0]), jnp.float32)
    out_big = mlp_forward(x_big, w_fold, b_fold)
    jax.block_until_ready(out_big)
    ref_big = mlp_reference(x_big, params)
    assert out_big.shape == (300, 1)
    assert jnp.allclose(out_big, ref_big, atol=1e-5, rtol=1e-5)

    print("KERNEL_OK")
</pallas_src>

<mosaic_0001>
module attributes {stable_mosaic.version = 11 : i64} {
  func.func @_affine_kernel_dout1(%arg0: i32, %arg1: memref<16x8xf32, #tpu.memory_space<vmem>>, %arg2: memref<16x1xf32, #tpu.memory_space<vmem>>, %arg3: memref<1x1xf32, #tpu.memory_space<vmem>>, %arg4: memref<1x8xf32, #tpu.memory_space<vmem>>) attributes {dimension_semantics = [#tpu.dimension_semantics<parallel>], iteration_bounds = array<i64: 1>, scalar_prefetch = 0 : i64, scratch_operands = 0 : i64, tpu.core_type = #tpu.core_type<tc>, window_params = [{transform_indices = @transform_0, window_bounds = array<i64: 16, 8>}, {pipeline_mode = #tpu.pipeline_mode<synchronous>, transform_indices = @transform_1, window_bounds = array<i64: 16, 1>}, {pipeline_mode = #tpu.pipeline_mode<synchronous>, transform_indices = @transform_2, window_bounds = array<i64: 1, 1>}, {transform_indices = @transform_3, window_bounds = array<i64: 1, 8>}]} {
    %c0 = arith.constant 0 : index
    %c0_0 = arith.constant 0 : index
    %0 = vector.load %arg1[%c0, %c0_0] : memref<16x8xf32, #tpu.memory_space<vmem>>, vector<16x8xf32>
    %c0_1 = arith.constant 0 : index
    %c0_2 = arith.constant 0 : index
    %1 = vector.load %arg2[%c0_1, %c0_2] : memref<16x1xf32, #tpu.memory_space<vmem>>, vector<16x1xf32>
    %2 = vector.broadcast %1 : vector<16x1xf32> to vector<16x8xf32>
    %3 = arith.mulf %0, %2 : vector<16x8xf32>
    %cst = arith.constant dense<0.000000e+00> : vector<8xf32>
    %4 = vector.multi_reduction <add>, %3, %cst [0] : vector<16x8xf32> to vector<8xf32>
    %5 = vector.shape_cast %4 : vector<8xf32> to vector<1x8xf32>
    %c0_3 = arith.constant 0 : index
    %c0_4 = arith.constant 0 : index
    %6 = vector.load %arg3[%c0_3, %c0_4] : memref<1x1xf32, #tpu.memory_space<vmem>>, vector<1x1xf32>
    %7 = vector.broadcast %6 : vector<1x1xf32> to vector<1x8xf32>
    %8 = arith.addf %5, %7 : vector<1x8xf32>
    %c0_5 = arith.constant 0 : index
    %c0_6 = arith.constant 0 : index
    %9 = vector.load %arg4[%c0_5, %c0_6] : memref<1x8xf32, #tpu.memory_space<vmem>>, vector<1x8xf32>
    tpu.vector_store %arg4[%c0_5, %c0_6], %8 {strides = array<i32>} : memref<1x8xf32, #tpu.memory_space<vmem>>, vector<1x8xf32>,
    return
  }
  func.func @transform_0(%arg0: i32) -> (i32, i32) {
    %c0_i32 = arith.constant 0 : i32
    %c0_i32_0 = arith.constant 0 : i32
    return %c0_i32, %arg0 : i32, i32
  }
  func.func @transform_1(%arg0: i32) -> (i32, i32) {
    %c0_i32 = arith.constant 0 : i32
    %c0_i32_0 = arith.constant 0 : i32
    %c0_i32_1 = arith.constant 0 : i32
    return %c0_i32, %c0_i32_0 : i32, i32
  }
  func.func @transform_2(%arg0: i32) -> (i32, i32) {
    %c0_i32 = arith.constant 0 : i32
    %c0_i32_0 = arith.constant 0 : i32
    %c0_i32_1 = arith.constant 0 : i32
    return %c0_i32, %c0_i32_0 : i32, i32
  }
  func.func @transform_3(%arg0: i32) -> (i32, i32) {
    %c0_i32 = arith.constant 0 : i32
    %c0_i32_0 = arith.constant 0 : i32
    return %c0_i32, %arg0 : i32, i32
  }
}

</mosaic_0001>

<bundles_post_ra>
// kernel: mlp_forward.1
= control target key start
LH: loop header
LB: loop body
LE: loop exit
PB: predicated region body
PF: predicated region fallthrough
CT: control target
= control target key end

     0   :  { %s136_s0 = inlined_call_operand.vmem [shape: f32[16,8], index: 0, kind: input, shape index: {}]   ;;  %s137_s1 = inlined_call_operand.vmem [shape: f32[16,1], index: 1, kind: input, shape index: {}]   ;;  %s138_s2 = inlined_call_operand.<no memory space> [shape: f32[1,1], index: 2, kind: input, shape index: {}]   ;;  %s139_s3 = inlined_call_operand.hbm [shape: f32[1,8], index: 3, kind: output, shape index: {}]  }
   0x1   :  { %v8_v0 = vstv %s138_s2 }
   0x2   :  { %9 = vst [vmem:[#allocation2] sm:$0x1] %v8_v0 }
   0x3   :  { %v19_v1 = vld [vmem:[%s137_s1] sm:$0xff]  ;;  %v96_v3 = vmov 0  }
   0x4   :  { %72 = vset.pattern.permute.xlu0 %v96_v3  ;;  %73 = vset.pattern.permute.xlu1 %v96_v3 }
   0x9   :  { %v43_v2 = vld [vmem:[#allocation2] sm:$0x1] }
   0xa   :  { %10 = vsyncpa [#allocation4], 0  ;;  %23 = vperm.xlu0 %72, %v19_v1   ;;  %46 = vperm.xlu1 %73, %v43_v2   ;;  %v20_v4 = vld [vmem:[%s137_s1 + $0x8] sm:$0xff]  ;;  %v17_v6 = vld [vmem:[%s136_s0] sm:$0xff]  ;;  %vm33_vm0 = vcmask 64512   ;;  %v49_v11 = vlaneseq  ;;  %s97_s1 = smov [#allocation3]  }
   0xb   :  { %v18_v7 = vld [vmem:[%s136_s0 + $0x8] sm:$0xff]  ;;  %s62_s21 = sshll.u32 %s97_s1, 4  ;;  %vm54_vm1 = vcmask 57344   ;;  %s63_s21 = int_to_ptr.vmem [resolvable:$true] %s62_s21 }
   0xc   :  { %v50_v16 = vshrl.u32 %v49_v11, 7  ;;  %s74_s0 = scalar_lea.vmem %s63_s21, 16  ;;  %s78_s22 = scalar_lea.vmem %s63_s21, 32 }
   0xd   :  { %p75_p0 = scmp.ne.s32.totalorder %s63_s21, %s74_s0  ;;  %p79_p1 = scmp.lt.s32.totalorder %s63_s21, %s63_s21 }
   0xe   :  { %28 = vperm.xlu0 %72, %v20_v4   ;;  %v51_v19 = vsub.s32 0, %v50_v16  ;;  %p80_p2 = scmp.lt.s32.totalorder %s78_s22, %s74_s0 }
  0x10   :  { %p81_p3 = por %p80_p2, %p79_p1 }
  0x12   :  { %p82_p4 = pnand %p81_p3, %p75_p0 }
  0x85   :  { %v24_v5 = vpop.permute.xlu0 %23  ;;  %v47_v20 = vpop.permute.xlu1 %46 }
  0x86   :  { %v31_v8 = vmul.f32 %v24_v5, %v17_v6  ;;  %v52_v23 = vrot.slane %v47_v20, %v51_v19 }
  0x88   :  { %v34_v12 = vsel %vm33_vm0, %v31_v8, 0.0 }
  0x89   :  { %v29_v9 = vpop.permute.xlu0 %28 }
  0x8a   :  { %v32_v10 = vmul.f32 %v29_v9, %v18_v7 }
  0x8c   :  { %v35_v13 = vsel %vm33_vm0, %v32_v10, 0.0 }
  0x8d   :  { %v36_v14 = vadd.f32 %v35_v13, %v34_v12 }
  0x8f   :  { %v37_v15 = vrot.slane %v36_v14, 4 }
  0x91   :  { %v38_v17 = vadd.f32 %v37_v15, %v36_v14 }
  0x93   :  { %v39_v18 = vrot.slane %v38_v17, 2 }
  0x95   :  { %v40_v21 = vadd.f32 %v39_v18, %v38_v17 }
  0x97   :  { %v41_v22 = vrot.slane %v40_v21, 1 }
  0x99   :  { %v42_v24 = vadd.f32 %v41_v22, %v40_v21 }
  0x9b   :  { %v53_v25 = vadd.f32 %v52_v23, %v42_v24 }
  0x9d   :  { %55 = vst.msk [vmem:[#allocation3] sm:$0x1] %vm54_vm1, %v53_v25 }
  0x9e   :  { %85 = shalt.err (!%p82_p4)
}
  0x9f   :  { %65 = dma.vmem_to_hbm [thread:$0]  %s63_s21, 16, %s139_s3, [#allocation4]  }
  0xa0   :  { %94 = dma.done.wait [#allocation4], 16  }
  0xa1   :  { %95 = vsyncadd [#allocation4], 4294967280 }
  0xa2   :  { %69 = vsyncpa [#allocation4], 1 }

</bundles_post_ra>
